<compile_context>
chip_gen: v6e
topology: v6e:2x2x1
jax: 0.10.0
libtpu: 0.0.40
codegen_flags: <defaults>
</compile_context>

<pallas_src>
import jax
import jax.numpy as jnp
from jax.experimental import pallas as pl
from jax.experimental.pallas import tpu as pltpu  # noqa: F401  (TPU backend)

# ---- module constants (mirrors the PyTorch __init__) -----------------------
EMBEDDING_DIM = 16
VOCAB = sorted(set("hello world"))          # [' ', 'd', 'e', 'h', 'l', 'o', 'r', 'w']
VOCAB_SIZE = len(VOCAB)                     # 8
LANES = 128                                 # lane-dense output width


# ---- Pallas kernel ----------------------------------------------------------
def tiny_transformer_kernel(ids_ref, table_ref, out_ref):
    # ids_ref  : (S_pad, 1)   int32 in VMEM (padded token ids)
    # table_ref: (V, 128)     f32 in VMEM, row v = emb[v] @ W^T + b, lane-padded
    # out_ref  : (S_pad, 128) f32 in VMEM (lane- and sublane-dense)
    s_pad = out_ref.shape[0]
    v_rows = table_ref.shape[0]

    ids = ids_ref[...]                                              # (S_pad, 1)
    vocab_iota = jax.lax.broadcasted_iota(jnp.int32, (s_pad, v_rows), 1)
    onehot = (vocab_iota == ids).astype(jnp.float32)                # (S_pad, V)

    # One MXU pass + one dense store (2 full vregs), replacing 11 masked stores.
    out_ref[...] = jnp.dot(onehot, table_ref[...],
                           preferred_element_type=jnp.float32)


# ---- one-time weight prep (outside the per-call path) -----------------------
def prepare_fused_table(emb_table, fc_weight, fc_bias):
    """Fold embedding @ fc_weight.T + fc_bias into a (V, 128) lane-padded table."""
    table = jnp.dot(emb_table.astype(jnp.float32),
                    fc_weight.astype(jnp.float32).T,
                    preferred_element_type=jnp.float32)             # (V, V)
    table = table + fc_bias.astype(jnp.float32)[None, :]
    return jnp.pad(table, ((0, 0), (0, LANES - table.shape[1])))    # (V, 128)


# ---- per-call forward --------------------------------------------------------
@jax.jit
def tiny_transformer_forward(token_ids, fused_table_padded):
    """token_ids: (S,) int32; fused_table_padded: (V, 128) f32 from prepare."""
    S = token_ids.shape[0]
    v_rows, v_lanes = fused_table_padded.shape
    s_pad = max(8, ((S + 7) // 8) * 8)      # sublane-pad sequence (11 -> 16)

    # Pad ids to a full sublane group; padded rows produce junk rows that are
    # sliced off below (layout plumbing only).
    ids = jnp.zeros((s_pad, 1), jnp.int32).at[:S, 0].set(token_ids.astype(jnp.int32))

    out_padded = pl.pallas_call(
        tiny_transformer_kernel,
        out_shape=jax.ShapeDtypeStruct((s_pad, v_lanes), jnp.float32),
        in_specs=[pl.BlockSpec((s_pad, 1), lambda: (0, 0)),
                  pl.BlockSpec((v_rows, v_lanes), lambda: (0, 0))],
        out_specs=pl.BlockSpec((s_pad, v_lanes), lambda: (0, 0)),
    )(ids, fused_table_padded)

    # Restore the exact nn.Linear contract: (input_length, vocab_size).
    return out_padded[:S, :VOCAB_SIZE]


# ---- driver -----------------------------------------------------------------
if __name__ == "__main__":
    key = jax.random.PRNGKey(0)
    k_emb, k_w, k_b = jax.random.split(key, 3)

    # Deterministic parameter init (shapes match nn.Embedding / nn.Linear).
    emb_table = jax.random.normal(k_emb, (VOCAB_SIZE, EMBEDDING_DIM), jnp.float32)
    bound = 1.0 / (EMBEDDING_DIM ** 0.5)
    fc_weight = jax.random.uniform(k_w, (VOCAB_SIZE, EMBEDDING_DIM),
                                   jnp.float32, -bound, bound)
    fc_bias = jax.random.uniform(k_b, (VOCAB_SIZE,), jnp.float32, -bound, bound)

    # One-time weight prep, amortized across every subsequent forward call.
    fused_table = jax.block_until_ready(
        prepare_fused_table(emb_table, fc_weight, fc_bias))

    # Example input: token ids for "hello world" (input_length = 11).
    char_to_id = {c: i for i, c in enumerate(VOCAB)}
    token_ids = jnp.array([char_to_id[c] for c in "hello world"], dtype=jnp.int32)

    out = tiny_transformer_forward(token_ids, fused_table)
    out = jax.block_until_ready(out)

    # Reference check in plain JAX (unfused embedding gather + linear).
    ref = emb_table[token_ids] @ fc_weight.T + fc_bias
    assert out.shape == (token_ids.shape[0], VOCAB_SIZE), out.shape
    assert jnp.allclose(out, ref, atol=1e-5, rtol=1e-5)

    print("KERNEL_OK")
</pallas_src>

<mosaic_0001>
module attributes {stable_mosaic.version = 11 : i64} {
  func.func @tiny_transformer_kernel(%arg0: memref<16x1xi32, #tpu.memory_space<vmem>>, %arg1: memref<8x128xf32, #tpu.memory_space<vmem>>, %arg2: memref<16x128xf32, #tpu.memory_space<vmem>>) attributes {dimension_semantics = [], scalar_prefetch = 0 : i64, scratch_operands = 0 : i64, tpu.core_type = #tpu.core_type<tc>} {
    %c0 = arith.constant 0 : index
    %c0_0 = arith.constant 0 : index
    %0 = vector.load %arg0[%c0, %c0_0] : memref<16x1xi32, #tpu.memory_space<vmem>>, vector<16x1xi32>
    %1 = tpu.iota {dimensions = array<i32: 1>} : vector<16x8xi32>
    %2 = vector.broadcast %0 : vector<16x1xi32> to vector<16x8xi32>
    %3 = arith.cmpi eq, %1, %2 : vector<16x8xi32>
    %4 = arith.extui %3 : vector<16x8xi1> to vector<16x8xi32>
    %5 = arith.sitofp %4 : vector<16x8xi32> to vector<16x8xf32>
    %c0_1 = arith.constant 0 : index
    %c0_2 = arith.constant 0 : index
    %6 = vector.load %arg1[%c0_1, %c0_2] : memref<8x128xf32, #tpu.memory_space<vmem>>, vector<8x128xf32>
    %cst = arith.constant dense<0.000000e+00> : vector<16x128xf32>
    %7 = tpu.matmul %5, %6, %cst {dimension_numbers = #tpu.dot_dimension_numbers<[1], [0], [0], [1], [0, 0, 1, 1], [], []>} : vector<16x8xf32>, vector<8x128xf32>, vector<16x128xf32> -> vector<16x128xf32>
    %c0_3 = arith.constant 0 : index
    %c0_4 = arith.constant 0 : index
    %8 = vector.load %arg2[%c0_3, %c0_4] : memref<16x128xf32, #tpu.memory_space<vmem>>, vector<16x128xf32>
    tpu.vector_store %arg2[%c0_3, %c0_4], %7 {strides = array<i32>} : memref<16x128xf32, #tpu.memory_space<vmem>>, vector<16x128xf32>,
    return
  }
}

</mosaic_0001>

<bundles_post_ra>
// kernel: tiny_transformer_forward.1
= control target key start
LH: loop header
LB: loop body
LE: loop exit
PB: predicated region body
PF: predicated region fallthrough
CT: control target
= control target key end

     0   :  { %v131_v0 = vmov 0   ;;  %v13_v4 = vlaneseq  ;;  %vm28_vm0 = vcmask 64512   ;;  %v132_v7 = vmov 0.0   ;;  %s163_s0 = inlined_call_operand.vmem [shape: s32[16,1], index: 0, kind: input, shape index: {}]   ;;  %s164_s1 = inlined_call_operand.vmem [shape: f32[8,128], index: 1, kind: input, shape index: {}]   ;;  %s165_s2 = inlined_call_operand.vmem [shape: f32[16,128], index: 2, kind: output, shape index: {}]  }
   0x1   :  { %130 = vset.pattern.permute.xlu0 %v131_v0  ;;  %v11_v1 = vld [vmem:[%s163_s0] sm:$0xff]  ;;  %v12_v3 = vld [vmem:[%s163_s0 + $0x8] sm:$0xff] }
   0x2   :  { %v27_v2 = vld [vmem:[%s164_s1] sm:$0xff]  ;;  %16 = vperm.xlu0 %130, %v11_v1   ;;  %v14_v5 = vand.u32 127, %v13_v4 }
   0x3   :  { %123 = vmatprep.subr.mxu0 %v27_v2 }
   0x4   :  { %124 = vmatpush3.msra.mxu0 %v27_v2 }
   0x6   :  { %19 = vperm.xlu0 %130, %v12_v3  }
  0x7d   :  { %v17_v6 = vpop.permute.xlu0 %16 }
  0x7e   :  { %vm21_vm1 = vcmp.eq.s32.totalorder %v14_v5, %v17_v6 }
  0x7f   :  { %v116_v8 = vsel %vm21_vm1, 1.0, %v132_v7 }
  0x80   :  { %125 = vmatprep.mubr.msk.f32.mxu0 %vm28_vm0, %v116_v8 }
  0x81   :  { %v20_v9 = vpop.permute.xlu0 %19 }
  0x82   :  { %vm22_vm2 = vcmp.eq.s32.totalorder %v14_v5, %v20_v9 }
  0x83   :  { %v117_v10 = vsel %vm22_vm2, 1.0, %v132_v7 }
  0x84   :  { %126 = vmatmul.mubr.msk.f32.vlgmr.msra.gmra.mxu0 %vm28_vm0, %v117_v10 }
 0x144   :  { %v127_v11 = vpop.f32.mrf.mxu0 }
 0x145   :  { %111 = vst [vmem:[%s165_s2 + $0x8] sm:$0xff] %v127_v11 }
 0x146   :  { %v101_v12 = vpop.f32.mrf.mxu0 }
 0x147   :  { %110 = vst [vmem:[%s165_s2] sm:$0xff] %v101_v12 }

</bundles_post_ra>
